<compile_context>
chip_gen: v7x
topology: tpu7x:2x2x1
jax: 0.10.0
libtpu: 0.0.40
codegen_flags: <defaults>
</compile_context>

<pallas_src>
import functools
import math

import jax
import jax.numpy as jnp
from jax.experimental import pallas as pl
from jax.experimental.pallas import tpu as pltpu


_GELU_C1 = math.sqrt(2.0 / math.pi)
_GELU_C2 = 0.044715 * _GELU_C1


def _gelu_tanh(x):
    # PyTorch nn.GELU(approximate='tanh'):
    #   0.5 * x * (1 + tanh(sqrt(2/pi) * (x + 0.044715 * x^3)))
    # with the sqrt(2/pi) factor folded into both polynomial terms.
    z = x * (_GELU_C1 + _GELU_C2 * x * x)
    return 0.5 * x * (1.0 + jnp.tanh(z))


def _round_up(n, m):
    return ((n + m - 1) // m) * m


def _pad2(a, rows, cols):
    if a.shape == (rows, cols):
        return a
    return jnp.pad(a, ((0, rows - a.shape[0]), (0, cols - a.shape[1])))


def _pad1(a, n):
    if a.shape == (n,):
        return a
    return jnp.pad(a, ((0, n - a.shape[0]),))


def _vmem_capacity_bytes():
    try:
        return int(pltpu.get_tpu_info().vmem_capacity_bytes)
    except Exception:
        return 64 << 20   # conservative fallback (v7x-sized)


# --------------------------------------------------------------------------
# Kernels
# --------------------------------------------------------------------------
def mlp_resident_kernel(x_ref, wfc_ref, bfc_ref, wproj_ref, bproj_ref, o_ref,
                        *, gelu_dtype):
    """Weights fully VMEM-resident; grid = (row tiles,), no reduction axis."""
    h = jnp.dot(x_ref[...], wfc_ref[...], preferred_element_type=jnp.float32)
    h = h + bfc_ref[...]                       # bias is f32
    if gelu_dtype is not None:
        h = h.astype(gelu_dtype)               # e.g. bf16 GELU on v6e/v7x
    h = _gelu_tanh(h)
    y = jnp.dot(h.astype(wproj_ref.dtype), wproj_ref[...],
                preferred_element_type=jnp.float32)
    o_ref[...] = (y + bproj_ref[...]).astype(o_ref.dtype)


def mlp_streaming_kernel(x_ref, wfc_ref, bfc_ref, wproj_ref, bproj_ref, o_ref,
                         acc_ref, *, gelu_dtype):
    """Weights streamed in (Ep, th)/(th, Ep) slabs; grid = (rows, hidden)."""
    k = pl.program_id(1)
    last = pl.num_programs(1) - 1

    h = jnp.dot(x_ref[...], wfc_ref[...], preferred_element_type=jnp.float32)
    h = h + bfc_ref[...]
    if gelu_dtype is not None:
        h = h.astype(gelu_dtype)
    h = _gelu_tanh(h)
    partial = jnp.dot(h.astype(wproj_ref.dtype), wproj_ref[...],
                      preferred_element_type=jnp.float32)

    @pl.when(k == 0)
    def _():
        acc_ref[...] = jnp.zeros_like(acc_ref)

    @pl.when(k < last)
    def _():
        acc_ref[...] += partial

    @pl.when(k == last)
    def _():
        # Fuse the last partial + bias directly into the output store.
        o_ref[...] = (acc_ref[...] + partial + bproj_ref[...]).astype(o_ref.dtype)


# --------------------------------------------------------------------------
# Wrapper
# --------------------------------------------------------------------------
def mlp_forward(x, w_fc, b_fc, w_proj, b_proj, *, tm=512, th=512,
                matmul_dtype=jnp.bfloat16, gelu_dtype=None,
                vmem_limit_bytes=None, force_streaming=False):
    """x: [B, T, E]; w_fc: [E, 4E]; b_fc: [4E]; w_proj: [4E, E]; b_proj: [E].

    Weights are stored pre-transposed as [in_features, out_features] so the
    kernel computes x @ W + b (== PyTorch nn.Linear y = x @ W.T + b).
    matmul_dtype casts x / weights for the MXU (default bf16); both matmuls
    accumulate in f32.  gelu_dtype=None keeps bias+GELU in f32 (safe on v5e);
    pass jnp.bfloat16 on v6e/v7x to halve the VPU/EUP work.
    """
    B, T, E = x.shape
    H = w_fc.shape[1]
    M = B * T
    out_dtype = x.dtype

    # ---- dtype handling --------------------------------------------------
    # NOTE: in a real model, pad/cast the weights once at parameter init.
    wt_dtype = matmul_dtype if matmul_dtype is not None else w_fc.dtype
    if matmul_dtype is not None:
        if x.dtype != matmul_dtype:
            x = x.astype(matmul_dtype)
        if w_fc.dtype != matmul_dtype:
            w_fc = w_fc.astype(matmul_dtype)
        if w_proj.dtype != matmul_dtype:
            w_proj = w_proj.astype(matmul_dtype)
    b_fc = b_fc.astype(jnp.float32)
    b_proj = b_proj.astype(jnp.float32)

    xb = jnp.dtype(x.dtype).itemsize
    wb = jnp.dtype(wt_dtype).itemsize
    ob = jnp.dtype(out_dtype).itemsize

    # ---- tile sizing / padding bookkeeping -------------------------------
    Ep = _round_up(E, 128)                       # lane-dense output stores
    tm = max(16, min(tm, _round_up(M, 16)))      # big row tile (bf16-safe)
    # Keep >= 2 row tiles when M is large enough so the "parallel" row axis
    # can load-balance across the 2 TensorCores on v7x.
    if M >= 512 and _round_up(M, tm) // tm < 2:
        tm = _round_up((M + 1) // 2, 16)
    Mp = _round_up(M, tm)

    # ---- generation-aware VMEM budget ------------------------------------
    cap = _vmem_capacity_bytes()                 # physical VMEM (64/128 MiB)
    budget = cap - max(8 << 20, cap // 8)        # leave headroom

    # ---- cost estimate (2 matmuls + tanh per hidden element) -------------
    cost = pl.CostEstimate(
        flops=4 * M * E * H,
        transcendentals=M * H,
        bytes_accessed=int(M * E * (xb + ob) + 2 * E * H * wb + (H + E) * 4))

    # ---- residency decision ----------------------------------------------
    Hp_res = _round_up(H, 128)
    weight_bytes = 2 * Ep * Hp_res * wb
    resident_est = (2 * weight_bytes                     # weights (worst-case 2 bufs)
                    + 2 * tm * Ep * xb                   # x row tiles
                    + 2 * tm * Ep * ob                   # output tiles
                    + 2 * 8 * Hp_res * 4 + 2 * 8 * Ep * 4  # biases (sublane-padded)
                    + tm * Hp_res * (4 + wb)             # f32 h + low-precision copy
                    + (4 << 20))                         # slack
    use_resident = (not force_streaming) and resident_est <= budget

    if use_resident:
        Hp = Hp_res
        x2 = _pad2(x.reshape(M, E), Mp, Ep)
        w_fc_p = _pad2(w_fc, Ep, Hp)
        b_fc_p = _pad1(b_fc, Hp).reshape(1, Hp)
        w_proj_p = _pad2(w_proj, Hp, Ep)
        b_proj_p = _pad1(b_proj, Ep).reshape(1, Ep)

        vmem = (min(max(int(resident_est), 32 << 20), budget)
                if vmem_limit_bytes is None else min(vmem_limit_bytes, budget))

        kernel = functools.partial(mlp_resident_kernel, gelu_dtype=gelu_dtype)
        out = pl.pallas_call(
            kernel,
            out_shape=jax.ShapeDtypeStruct((Mp, Ep), out_dtype),
            grid_spec=pltpu.PrefetchScalarGridSpec(
                num_scalar_prefetch=0,
                grid=(Mp // tm,),
                in_specs=[
                    pl.BlockSpec((tm, Ep), lambda i: (i, 0)),   # x row tile
                    pl.BlockSpec((Ep, Hp), lambda i: (0, 0)),   # c_fc weight (resident)
                    pl.BlockSpec((1, Hp), lambda i: (0, 0)),    # c_fc bias
                    pl.BlockSpec((Hp, Ep), lambda i: (0, 0)),   # c_proj weight (resident)
                    pl.BlockSpec((1, Ep), lambda i: (0, 0)),    # c_proj bias
                ],
                out_specs=pl.BlockSpec((tm, Ep), lambda i: (i, 0)),
            ),
            compiler_params=pltpu.CompilerParams(
                dimension_semantics=("parallel",),
                vmem_limit_bytes=vmem),
            cost_estimate=cost,
        )(x2, w_fc_p, b_fc_p, w_proj_p, b_proj_p)
        return out[:M, :E].reshape(B, T, E)

    # ---- streaming fallback (weights too large for VMEM) ------------------
    th = _round_up(min(th, _round_up(H, 128)), 128)
    Hp = _round_up(_round_up(H, 128), th)

    x2 = _pad2(x.reshape(M, E), Mp, Ep)
    w_fc_p = _pad2(w_fc, Ep, Hp)
    b_fc_p = _pad1(b_fc, Hp).reshape(1, Hp)
    w_proj_p = _pad2(w_proj, Hp, Ep)
    b_proj_p = _pad1(b_proj, Ep).reshape(1, Ep)

    est = (2 * tm * Ep * xb                      # x row tile
           + 2 * Ep * th * wb + 2 * th * Ep * wb  # weight slabs
           + 2 * 8 * th * 4 + 2 * 8 * Ep * 4     # biases
           + 2 * tm * Ep * ob                    # output tile
           + tm * Ep * 4                         # f32 accumulator scratch
           + tm * th * (4 + wb)                  # f32 h + low-precision copy
           + (4 << 20))
    vmem = (min(max(int(est), 32 << 20), budget)
            if vmem_limit_bytes is None else min(vmem_limit_bytes, budget))

    kernel = functools.partial(mlp_streaming_kernel, gelu_dtype=gelu_dtype)
    out = pl.pallas_call(
        kernel,
        out_shape=jax.ShapeDtypeStruct((Mp, Ep), out_dtype),
        grid_spec=pltpu.PrefetchScalarGridSpec(
            num_scalar_prefetch=0,
            grid=(Mp // tm, Hp // th),
            in_specs=[
                pl.BlockSpec((tm, Ep), lambda i, k: (i, 0)),   # x row tile
                pl.BlockSpec((Ep, th), lambda i, k: (0, k)),   # c_fc weight slab
                pl.BlockSpec((1, th), lambda i, k: (0, k)),    # c_fc bias slab
                pl.BlockSpec((th, Ep), lambda i, k: (k, 0)),   # c_proj weight slab
                pl.BlockSpec((1, Ep), lambda i, k: (0, 0)),    # c_proj bias
            ],
            out_specs=pl.BlockSpec((tm, Ep), lambda i, k: (i, 0)),
            scratch_shapes=[pltpu.VMEM((tm, Ep), jnp.float32)],
        ),
        compiler_params=pltpu.CompilerParams(
            dimension_semantics=("parallel", "arbitrary"),
            vmem_limit_bytes=vmem),
        cost_estimate=cost,
    )(x2, w_fc_p, b_fc_p, w_proj_p, b_proj_p)
    return out[:M, :E].reshape(B, T, E)


# --------------------------------------------------------------------------
# Reference + tests
# --------------------------------------------------------------------------
def reference_mlp(x, w_fc, b_fc, w_proj, b_proj):
    hi = jax.lax.Precision.HIGHEST
    h = jnp.einsum("bte,eh->bth", x, w_fc, precision=hi) + b_fc
    h = _gelu_tanh(h)
    return jnp.einsum("bth,he->bte", h, w_proj, precision=hi) + b_proj


def _make_params(key, B, T, E):
    H = 4 * E
    kx, kw1, kb1, kw2, kb2 = jax.random.split(key, 5)
    x = jax.random.normal(kx, (B, T, E), dtype=jnp.float32)
    w_fc = jax.random.normal(kw1, (E, H), dtype=jnp.float32) / math.sqrt(E)
    b_fc = jax.random.normal(kb1, (H,), dtype=jnp.float32) * 0.01
    w_proj = jax.random.normal(kw2, (H, E), dtype=jnp.float32) / math.sqrt(H)
    b_proj = jax.random.normal(kb2, (E,), dtype=jnp.float32) * 0.01
    return x, w_fc, b_fc, w_proj, b_proj


if __name__ == "__main__":
    key = jax.random.PRNGKey(0)
    k1, k2 = jax.random.split(key)

    # Test 1: toy GPT-like shapes (E=32 -> exercises E/lane padding),
    # f32 MXU path, tight tolerance.
    x, w_fc, b_fc, w_proj, b_proj = _make_params(k1, 2, 8, 32)
    y = jax.block_until_ready(
        mlp_forward(x, w_fc, b_fc, w_proj, b_proj, matmul_dtype=None))
    y_ref = reference_mlp(x, w_fc, b_fc, w_proj, b_proj)
    assert y.shape == x.shape
    assert jnp.allclose(y, y_ref, atol=1e-3, rtol=1e-3), "mismatch (test 1)"

    # Test 2: resident-weights path, default bf16 MXU, 2 row tiles.
    x, w_fc, b_fc, w_proj, b_proj = _make_params(k2, 4, 128, 128)
    y = jax.block_until_ready(mlp_forward(x, w_fc, b_fc, w_proj, b_proj))
    y_ref = reference_mlp(x, w_fc, b_fc, w_proj, b_proj)
    assert y.shape == x.shape
    assert jnp.allclose(y, y_ref, atol=2e-2, rtol=2e-2), "mismatch (test 2)"

    # Test 3: force the streaming fallback (2 row tiles x 2 hidden tiles).
    y = jax.block_until_ready(
        mlp_forward(x, w_fc, b_fc, w_proj, b_proj, tm=256, th=256,
                    force_streaming=True))
    assert y.shape == x.shape
    assert jnp.allclose(y, y_ref, atol=2e-2, rtol=2e-2), "mismatch (test 3)"

    print("KERNEL_OK")
</pallas_src>

<mosaic_0001>
module attributes {stable_mosaic.version = 11 : i64} {
  func.func @mlp_resident_kernel(%arg0: i32, %arg1: memref<16x128xf32, #tpu.memory_space<vmem>>, %arg2: memref<128x128xf32, #tpu.memory_space<vmem>>, %arg3: memref<1x128xf32, #tpu.memory_space<vmem>>, %arg4: memref<128x128xf32, #tpu.memory_space<vmem>>, %arg5: memref<1x128xf32, #tpu.memory_space<vmem>>, %arg6: memref<16x128xf32, #tpu.memory_space<vmem>>) attributes {dimension_semantics = [#tpu.dimension_semantics<parallel>], iteration_bounds = array<i64: 1>, scalar_prefetch = 0 : i64, scratch_operands = 0 : i64, tpu.core_type = #tpu.core_type<tc>, window_params = [{transform_indices = @transform_0, window_bounds = array<i64: 16, 128>}, {pipeline_mode = #tpu.pipeline_mode<synchronous>, transform_indices = @transform_1, window_bounds = array<i64: 128, 128>}, {pipeline_mode = #tpu.pipeline_mode<synchronous>, transform_indices = @transform_2, window_bounds = array<i64: 1, 128>}, {pipeline_mode = #tpu.pipeline_mode<synchronous>, transform_indices = @transform_3, window_bounds = array<i64: 128, 128>}, {pipeline_mode = #tpu.pipeline_mode<synchronous>, transform_indices = @transform_4, window_bounds = array<i64: 1, 128>}, {transform_indices = @transform_5, window_bounds = array<i64: 16, 128>}]} {
    %c0 = arith.constant 0 : index
    %c0_0 = arith.constant 0 : index
    %0 = vector.load %arg1[%c0, %c0_0] : memref<16x128xf32, #tpu.memory_space<vmem>>, vector<16x128xf32>
    %c0_1 = arith.constant 0 : index
    %c0_2 = arith.constant 0 : index
    %1 = vector.load %arg2[%c0_1, %c0_2] : memref<128x128xf32, #tpu.memory_space<vmem>>, vector<128x128xf32>
    %cst = arith.constant dense<0.000000e+00> : vector<16x128xf32>
    %2 = tpu.matmul %0, %1, %cst {dimension_numbers = #tpu.dot_dimension_numbers<[1], [0], [0], [1], [0, 0, 1, 1], [], []>} : vector<16x128xf32>, vector<128x128xf32>, vector<16x128xf32> -> vector<16x128xf32>
    %c0_3 = arith.constant 0 : index
    %c0_4 = arith.constant 0 : index
    %3 = vector.load %arg3[%c0_3, %c0_4] : memref<1x128xf32, #tpu.memory_space<vmem>>, vector<1x128xf32>
    %4 = vector.broadcast %3 : vector<1x128xf32> to vector<16x128xf32>
    %5 = arith.addf %2, %4 : vector<16x128xf32>
    %cst_5 = arith.constant 0.0356774069 : f32
    %6 = vector.broadcast %cst_5 : f32 to vector<16x128xf32>
    %7 = arith.mulf %6, %5 : vector<16x128xf32>
    %8 = arith.mulf %7, %5 : vector<16x128xf32>
    %cst_6 = arith.constant 0.797884583 : f32
    %9 = vector.broadcast %cst_6 : f32 to vector<16x128xf32>
    %10 = arith.addf %9, %8 : vector<16x128xf32>
    %11 = arith.mulf %5, %10 : vector<16x128xf32>
    %cst_7 = arith.constant 5.000000e-01 : f32
    %12 = vector.broadcast %cst_7 : f32 to vector<16x128xf32>
    %13 = arith.mulf %12, %5 : vector<16x128xf32>
    %14 = math.tanh %11 : vector<16x128xf32>
    %cst_8 = arith.constant 1.000000e+00 : f32
    %15 = vector.broadcast %cst_8 : f32 to vector<16x128xf32>
    %16 = arith.addf %15, %14 : vector<16x128xf32>
    %17 = arith.mulf %13, %16 : vector<16x128xf32>
    %c0_9 = arith.constant 0 : index
    %c0_10 = arith.constant 0 : index
    %18 = vector.load %arg4[%c0_9, %c0_10] : memref<128x128xf32, #tpu.memory_space<vmem>>, vector<128x128xf32>
    %cst_11 = arith.constant dense<0.000000e+00> : vector<16x128xf32>
    %19 = tpu.matmul %17, %18, %cst_11 {dimension_numbers = #tpu.dot_dimension_numbers<[1], [0], [0], [1], [0, 0, 1, 1], [], []>} : vector<16x128xf32>, vector<128x128xf32>, vector<16x128xf32> -> vector<16x128xf32>
    %c0_12 = arith.constant 0 : index
    %c0_13 = arith.constant 0 : index
    %20 = vector.load %arg5[%c0_12, %c0_13] : memref<1x128xf32, #tpu.memory_space<vmem>>, vector<1x128xf32>
    %21 = vector.broadcast %20 : vector<1x128xf32> to vector<16x128xf32>
    %22 = arith.addf %19, %21 : vector<16x128xf32>
    %c0_14 = arith.constant 0 : index
    %c0_15 = arith.constant 0 : index
    %23 = vector.load %arg6[%c0_14, %c0_15] : memref<16x128xf32, #tpu.memory_space<vmem>>, vector<16x128xf32>
    tpu.vector_store %arg6[%c0_14, %c0_15], %22 {strides = array<i32>} : memref<16x128xf32, #tpu.memory_space<vmem>>, vector<16x128xf32>,
    return
  }
  func.func @transform_0(%arg0: i32) -> (i32, i32) {
    %c0_i32 = arith.constant 0 : i32
    %c0_i32_0 = arith.constant 0 : i32
    return %arg0, %c0_i32 : i32, i32
  }
  func.func @transform_1(%arg0: i32) -> (i32, i32) {
    %c0_i32 = arith.constant 0 : i32
    %c0_i32_0 = arith.constant 0 : i32
    %c0_i32_1 = arith.constant 0 : i32
    return %c0_i32, %c0_i32_0 : i32, i32
  }
  func.func @transform_2(%arg0: i32) -> (i32, i32) {
    %c0_i32 = arith.constant 0 : i32
    %c0_i32_0 = arith.constant 0 : i32
    %c0_i32_1 = arith.constant 0 : i32
    return %c0_i32, %c0_i32_0 : i32, i32
  }
  func.func @transform_3(%arg0: i32) -> (i32, i32) {
    %c0_i32 = arith.constant 0 : i32
    %c0_i32_0 = arith.constant 0 : i32
    %c0_i32_1 = arith.constant 0 : i32
    return %c0_i32, %c0_i32_0 : i32, i32
  }
  func.func @transform_4(%arg0: i32) -> (i32, i32) {
    %c0_i32 = arith.constant 0 : i32
    %c0_i32_0 = arith.constant 0 : i32
    %c0_i32_1 = arith.constant 0 : i32
    return %c0_i32, %c0_i32_0 : i32, i32
  }
  func.func @transform_5(%arg0: i32) -> (i32, i32) {
    %c0_i32 = arith.constant 0 : i32
    %c0_i32_0 = arith.constant 0 : i32
    return %arg0, %c0_i32 : i32, i32
  }
}

</mosaic_0001>

<bundles_post_ra>
// kernel: tpu_custom_call.1
= control target key start
LH: loop header
LB: loop body
LE: loop exit
PB: predicated region body
PF: predicated region fallthrough
CT: control target
= control target key end

     0   :  { %10 = vsyncpa [#allocation3], 0  ;;  %s681_s0 = inlined_call_operand.hbm [shape: f32[16,128], index: 0, kind: input, shape index: {}]   ;;  %s682_s1 = inlined_call_operand.hbm [shape: f32[128,128], index: 1, kind: input, shape index: {}]   ;;  %s683_s2 = inlined_call_operand.vmem [shape: f32[1,128], index: 2, kind: input, shape index: {}]   ;;  %s684_s3 = inlined_call_operand.hbm [shape: f32[128,128], index: 3, kind: input, shape index: {}]   ;;  %s685_s4 = inlined_call_operand.vmem [shape: f32[1,128], index: 4, kind: input, shape index: {}]   ;;  %s686_s5 = inlined_call_operand.hbm [shape: f32[16,128], index: 5, kind: output, shape index: {}]  }
   0x1   :  { %11 = vsyncpa [#allocation6], 0 }
   0x2   :  { %12 = vsyncpa [#allocation4], 0  ;;  %s572_s18 = smov [#allocation5]   ;;  %s573_s20 = smov [#allocation2]  }
   0x3   :  { %s30_s19 = sshll.u32 %s572_s18, 4  ;;  %s18_s21 = sshll.u32 %s573_s20, 4  ;;  %s31_s19 = int_to_ptr.vmem [resolvable:$true] %s30_s19  ;;  %s608_s21 = int_to_ptr.vmem [resolvable:$true] %s18_s21 }
   0x4   :  { %s478_s24 = scalar_lea.hbm %s682_s1, 2048 }
   0x5   :  { %p479_p0 = scmp.ne.s32.totalorder %s682_s1, %s478_s24  ;;  %p482_p1 = scmp.lt.u32.totalorder %s478_s24, %s682_s1 }
   0x7   :  { %p484_p2 = pnand %p482_p1, %p479_p0 }
   0x9   :  { %487 = shalt.err (!%p484_p2)
}
   0xa   :  { %s488_s29 = scalar_lea.vmem %s31_s19, 2048  ;;  %p493_p4 = scmp.lt.s32.totalorder %s31_s19, %s31_s19 }
   0xb   :  { %p489_p3 = scmp.ne.s32.totalorder %s31_s19, %s488_s29  ;;  %p494_p5 = scmp.lt.s32.totalorder %s488_s29, %s488_s29 }
   0xd   :  { %p495_p6 = por %p494_p5, %p493_p4 }
   0xf   :  { %p496_p7 = pnand %p495_p6, %p489_p3 }
  0x11   :  { %499 = shalt.err (!%p496_p7)
}
  0x12   :  { %s574_s30 = smov 128   ;;  %s575_s6 = smov 8  }
  0x13   :  { %36 = dma.hbm_to_vmem [thread:$0]  %s682_s1, 2048, %s31_s19, [#allocation6], %s574_s30, %s574_s30, %s575_s6  }
  0x14   :  { %s500_s11 = scalar_lea.hbm %s681_s0, 256 }
  0x15   :  { %p501_p8 = scmp.ne.s32.totalorder %s681_s0, %s500_s11  ;;  %p504_p9 = scmp.lt.u32.totalorder %s500_s11, %s681_s0 }
  0x17   :  { %p506_p10 = pnand %p504_p9, %p501_p8 }
  0x19   :  { %509 = shalt.err (!%p506_p10)
}
  0x1a   :  { %s510_s16 = scalar_lea.vmem %s608_s21, 256  ;;  %p515_p12 = scmp.lt.s32.totalorder %s608_s21, %s608_s21 }
  0x1b   :  { %p511_p11 = scmp.ne.s32.totalorder %s608_s21, %s510_s16  ;;  %p516_p13 = scmp.lt.s32.totalorder %s510_s16, %s510_s16 }
  0x1d   :  { %p517_p0 = por %p516_p13, %p515_p12 }
  0x1f   :  { %p518_p1 = pnand %p517_p0, %p511_p11 }
  0x21   :  { %521 = shalt.err (!%p518_p1)
}
  0x22   :  { %24 = dma.hbm_to_vmem [thread:$0]  %s681_s0, 256, %s608_s21, [#allocation3], %s574_s30, %s574_s30, %s575_s6  }
  0x23   :  { %s576_s18 = smov [#allocation7]   ;;  %s522_s23 = scalar_lea.hbm %s684_s3, 2048 }
  0x24   :  { %s44_s19 = sshll.u32 %s576_s18, 4  ;;  %p523_p2 = scmp.ne.s32.totalorder %s684_s3, %s522_s23  ;;  %s45_s19 = int_to_ptr.vmem [resolvable:$true] %s44_s19 }
  0x25   :  { %p526_p3 = scmp.lt.u32.totalorder %s522_s23, %s684_s3 }
  0x27   :  { %p528_p4 = pnand %p526_p3, %p523_p2 }
  0x29   :  { %531 = shalt.err (!%p528_p4)
}
  0x2a   :  { %s532_s28 = scalar_lea.vmem %s45_s19, 2048  ;;  %p537_p6 = scmp.lt.s32.totalorder %s45_s19, %s45_s19 }
  0x2b   :  { %p533_p5 = scmp.ne.s32.totalorder %s45_s19, %s532_s28  ;;  %p538_p7 = scmp.lt.s32.totalorder %s532_s28, %s532_s28 }
  0x2d   :  { %p539_p8 = por %p538_p7, %p537_p6 }
  0x2f   :  { %p540_p9 = pnand %p539_p8, %p533_p5 }
  0x31   :  { %543 = shalt.err (!%p540_p9)
}
  0x32   :  { %50 = dma.hbm_to_vmem [thread:$0]  %s684_s3, 2048, %s45_s19, [#allocation6], %s574_s30, %s574_s30, %s575_s6  }
  0x33   :  { %566 = dma.done.wait [#allocation3], 256  }
  0x34   :  { %567 = vsyncadd [#allocation3], 4294967040 }
  0x35   :  { %568 = dma.done.wait [#allocation6], 4096  }
  0x36   :  { %569 = vsyncadd [#allocation6], 4294963200  ;;  %v64_v0 = vld [vmem:[#allocation5] sm:$0xff]  ;;  %v65_v1 = vld [vmem:[#allocation5 + $0x8] sm:$0xff]  ;;  %s577_s8 = smov [#allocation8]  }
  0x37   :  { %v66_v2 = vld [vmem:[#allocation5 + $0x10] sm:$0xff]  ;;  %v404_v3 = vpack.c.bf16 %v65_v1, %v64_v0  ;;  %v67_v4 = vld [vmem:[#allocation5 + $0x18] sm:$0xff]  ;;  %v68_v6 = vld [vmem:[#allocation5 + $0x20] sm:$0xff]  ;;  %s283_s9 = sshll.u32 %s577_s8, 4  ;;  %s284_s9 = int_to_ptr.vmem [resolvable:$true] %s283_s9 }
  0x38   :  { %v408_v5 = vpack.c.bf16 %v67_v4, %v66_v2  ;;  %v69_v7 = vld [vmem:[#allocation5 + $0x28] sm:$0xff]  ;;  %v70_v9 = vld [vmem:[#allocation5 + $0x30] sm:$0xff]  ;;  %v71_v11 = vld [vmem:[#allocation5 + $0x38] sm:$0xff]  ;;  %s544_s10 = scalar_lea.vmem %s284_s9, 256  ;;  %p549_p11 = scmp.lt.s32.totalorder %s284_s9, %s284_s9 }
  0x39   :  { %405 = vmatprep.subr.bf16.mxu0 %v404_v3  ;;  %v412_v8 = vpack.c.bf16 %v69_v7, %v68_v6  ;;  %v62_v10 = vld [vmem:[#allocation2] sm:$0xff]  ;;  %v178_v12 = vld [vmem:[#allocation7] sm:$0xff]  ;;  %v179_v13 = vld [vmem:[#allocation7 + $0x8] sm:$0xff]  ;;  %v416_v15 = vpack.c.bf16 %v71_v11, %v70_v9  ;;  %p545_p10 = scmp.ne.s32.totalorder %s284_s9, %s544_s10  ;;  %p550_p12 = scmp.lt.s32.totalorder %s544_s10, %s544_s10 }
  0x3a   :  { %407 = vmatpush3.bf16.msra.mxu0 %v404_v3  ;;  %366 = vmatprep.mubr.f32.mxu0 %v62_v10  ;;  %v436_v14 = vpack.c.bf16 %v179_v13, %v178_v12  ;;  %v72_v16 = vld [vmem:[#allocation5 + $0x40] sm:$0xff]  ;;  %v73_v17 = vld [vmem:[#allocation5 + $0x48] sm:$0xff]  ;;  %v74_v19 = vld [vmem:[#allocation5 + $0x50] sm:$0xff] }
  0x3b   :  { %409 = vmatprep.subr.bf16.mxu0 %v408_v5  ;;  %v420_v18 = vpack.c.bf16 %v73_v17, %v72_v16  ;;  %v75_v20 = vld [vmem:[#allocation5 + $0x58] sm:$0xff]  ;;  %v76_v22 = vld [vmem:[#allocation5 + $0x60] sm:$0xff]  ;;  %v77_v23 = vld [vmem:[#allocation5 + $0x68] sm:$0xff]  ;;  %p551_p13 = por %p550_p12, %p549_p11 }
  0x3c   :  { %437 = vmatprep.subr.bf16.mxu1 %v436_v14  ;;  %v424_v21 = vpack.c.bf16 %v75_v20, %v74_v19  ;;  %v428_v24 = vpack.c.bf16 %v77_v23, %v76_v22  ;;  %v78_v25 = vld [vmem:[#allocation5 + $0x70] sm:$0xff]  ;;  %v79_v26 = vld [vmem:[#allocation5 + $0x78] sm:$0xff]  ;;  %v182_v32 = vld [vmem:[#allocation7 + $0x20] sm:$0xff] }
  0x3d   :  { %439 = vmatpush3.bf16.msra.mxu1 %v436_v14  ;;  %v432_v27 = vpack.c.bf16 %v79_v26, %v78_v25  ;;  %v63_v28 = vld [vmem:[#allocation2 + $0x8] sm:$0xff]  ;;  %v180_v29 = vld [vmem:[#allocation7 + $0x10] sm:$0xff]  ;;  %v183_v33 = vld [vmem:[#allocation7 + $0x28] sm:$0xff]  ;;  %p552_p0 = pnand %p551_p13, %p545_p10 }
  0x3e   :  { %411 = vmatpush3.bf16.msra.mxu0 %v408_v5  ;;  %v181_v30 = vld [vmem:[#allocation7 + $0x18] sm:$0xff]  ;;  %v444_v34 = vpack.c.bf16 %v183_v33, %v182_v32  ;;  %v184_v35 = vld [vmem:[#allocation7 + $0x30] sm:$0xff]  ;;  %v186_v38 = vld [vmem:[#allocation7 + $0x40] sm:$0xff] }
  0x3f   :  { %413 = vmatprep.subr.bf16.mxu0 %v412_v8  ;;  %v440_v31 = vpack.c.bf16 %v181_v30, %v180_v29  ;;  %v185_v36 = vld [vmem:[#allocation7 + $0x38] sm:$0xff]  ;;  %v187_v39 = vld [vmem:[#allocation7 + $0x48] sm:$0xff]  ;;  %v188_v40 = vld [vmem:[#allocation7 + $0x50] sm:$0xff] }
  0x40   :  { %v448_v37 = vpack.c.bf16 %v185_v36, %v184_v35  ;;  %v452_v41 = vpack.c.bf16 %v187_v39, %v186_v38  ;;  %v189_v42 = vld [vmem:[#allocation7 + $0x58] sm:$0xff]  ;;  %v190_v44 = vld [vmem:[#allocation7 + $0x60] sm:$0xff]  ;;  %v191_v45 = vld [vmem:[#allocation7 + $0x68] sm:$0xff] }
  0x41   :  { %441 = vmatprep.subr.bf16.mxu1 %v440_v31  ;;  %v456_v43 = vpack.c.bf16 %v189_v42, %v188_v40  ;;  %v460_v46 = vpack.c.bf16 %v191_v45, %v190_v44  ;;  %v192_v47 = vld [vmem:[#allocation7 + $0x70] sm:$0xff]  ;;  %v193_v48 = vld [vmem:[#allocation7 + $0x78] sm:$0xff] }
  0x42   :  { %415 = vmatpush3.bf16.msra.mxu0 %v412_v8  ;;  %443 = vmatpush3.bf16.msra.mxu1 %v440_v31  ;;  %v464_v49 = vpack.c.bf16 %v193_v48, %v192_v47  ;;  %v296_v50 = vld [vmem:[%s683_s2] ss:$0 sm:$0xff] }
  0x43   :  { %417 = vmatprep.subr.bf16.mxu0 %v416_v15  ;;  %445 = vmatprep.subr.bf16.mxu1 %v444_v34  ;;  %v297_v7 = vld [vmem:[%s685_s4] ss:$0 sm:$0xff] }
  0x46   :  { %419 = vmatpush3.bf16.msra.mxu0 %v416_v15  ;;  %447 = vmatpush3.bf16.msra.mxu1 %v444_v34 }
  0x47   :  { %421 = vmatprep.subr.bf16.mxu0 %v420_v18  ;;  %449 = vmatprep.subr.bf16.mxu1 %v448_v37 }
  0x4a   :  { %423 = vmatpush3.bf16.msra.mxu0 %v420_v18  ;;  %451 = vmatpush3.bf16.msra.mxu1 %v448_v37 }
  0x4b   :  { %425 = vmatprep.subr.bf16.mxu0 %v424_v21  ;;  %453 = vmatprep.subr.bf16.mxu1 %v452_v41 }
  0x4e   :  { %427 = vmatpush3.bf16.msra.mxu0 %v424_v21  ;;  %455 = vmatpush3.bf16.msra.mxu1 %v452_v41 }
  0x4f   :  { %429 = vmatprep.subr.bf16.mxu0 %v428_v24  ;;  %457 = vmatprep.subr.bf16.mxu1 %v456_v43 }
  0x52   :  { %431 = vmatpush3.bf16.msra.mxu0 %v428_v24  ;;  %459 = vmatpush3.bf16.msra.mxu1 %v456_v43 }
  0x53   :  { %433 = vmatprep.subr.bf16.mxu0 %v432_v27  ;;  %461 = vmatprep.subr.bf16.mxu1 %v460_v46 }
  0x56   :  { %435 = vmatpush3.bf16.msra.mxu0 %v432_v27  ;;  %463 = vmatpush3.bf16.msra.mxu1 %v460_v46 }
  0x57   :  { %465 = vmatprep.subr.bf16.mxu1 %v464_v49 }
  0x59   :  { %367 = vmatmul.mubr.f32.vlgmr.msra.gmra.mrb[0].mxu0 %v63_v28 }
  0x5a   :  { %467 = vmatpush3.bf16.msra.mxu1 %v464_v49 }
 0x12c   :  { %v368_v51 = vpop.f32.mrb[0].mxu0 }
 0x12d   :  { %v159_v52 = vadd.f32 %v368_v51, %v296_v50  ;;  %v153_v53 = vpop.f32.mrb[1].mxu0 }
 0x12e   :  { %v154_v54 = vadd.f32 %v296_v50, %v153_v53 }
 0x12f   :  { %v163_v55 = vmul.f32 0.035677407, %v159_v52  ;;  %v171_v4 = vmul.f32 0.5, %v159_v52 }
 0x130   :  { %v162_v56 = vmul.f32 0.035677407, %v154_v54  ;;  %v170_v2 = vmul.f32 0.5, %v154_v54 }
 0x131   :  { %v165_v57 = vmul.f32 %v163_v55, %v159_v52 }
 0x132   :  { %v164_v58 = vmul.f32 %v162_v56, %v154_v54 }
 0x133   :  { %v167_v59 = vadd.f32 0.7978846, %v165_v57 }
 0x134   :  { %v166_v60 = vadd.f32 0.7978846, %v164_v58 }
 0x135   :  { %v169_v61 = vmul.f32 %v167_v59, %v159_v52 }
 0x136   :  { %v168_v62 = vmul.f32 %v166_v60, %v154_v54 }
 0x137   :  { %474 = vtanh.f32 %v169_v61 }
 0x138   :  { %476 = vtanh.f32 %v168_v62 }
 0x141   :  { %v475_v63 = vpop.eup %474 }
 0x142   :  { %v477_v0 = vpop.eup %476  ;;  %v175_v1 = vadd.f32 1.0, %v475_v63 }
 0x143   :  { %v174_v3 = vadd.f32 1.0, %v477_v0 }
 0x144   :  { %v177_v6 = vmul.f32 %v175_v1, %v171_v4 }
 0x145   :  { %v176_v5 = vmul.f32 %v174_v3, %v170_v2 }
 0x147   :  { %401 = vmatprep.mubr.f32.mxu1 %v176_v5 }
 0x148   :  { %402 = vmatmul.mubr.f32.vlgmr.msra.gmra.mrb[0].mxu1 %v177_v6 }
 0x21b   :  { %v403_v8 = vpop.f32.mrb[0].mxu1 }
 0x21c   :  { %v273_v9 = vadd.f32 %v403_v8, %v297_v7  ;;  %v267_v10 = vpop.f32.mrb[1].mxu1 }
 0x21d   :  { %v268_v11 = vadd.f32 %v297_v7, %v267_v10 }
 0x21e   :  { %277 = vst [vmem:[#allocation8 + $0x8] sm:$0xff] %v273_v9 }
 0x21f   :  { %276 = vst [vmem:[#allocation8] sm:$0xff] %v268_v11 }
 0x220   :  { %555 = shalt.err (!%p552_p0)
}
 0x221   :  { %s556_s4 = scalar_lea.hbm %s686_s5, 256 }
 0x222   :  { %p557_p1 = scmp.ne.s32.totalorder %s686_s5, %s556_s4  ;;  %p560_p2 = scmp.lt.u32.totalorder %s556_s4, %s686_s5 }
 0x224   :  { %p562_p3 = pnand %p560_p2, %p557_p1 }
 0x226   :  { %565 = shalt.err (!%p562_p3)
}
 0x227   :  { %289 = dma.vmem_to_hbm [thread:$0]  %s284_s9, 256, %s686_s5, [#allocation4], %s574_s30, %s574_s30, %s575_s6  }
 0x228   :  { %570 = dma.done.wait [#allocation4], 256  }
 0x229   :  { %571 = vsyncadd [#allocation4], 4294967040 }
 0x22a   :  { %293 = vsyncpa [#allocation3], 1 }
 0x22b   :  { %294 = vsyncpa [#allocation6], 1 }
 0x22c   :  { %295 = vsyncpa [#allocation4], 1 }

</bundles_post_ra>
